<compile_context>
chip_gen: v6e
topology: v6e:2x2x1
jax: 0.10.0
libtpu: 0.0.40
codegen_flags: <defaults>
</compile_context>

<pallas_src>
import functools
import math

import jax
import jax.numpy as jnp
from jax.experimental import pallas as pl
from jax.experimental.pallas import tpu as pltpu


def _round_up(x, m):
    return ((x + m - 1) // m) * m


def _lstm_step_kernel(xg_ref, h0_ref, c0_ref, whh_hbm,
                      fused_ref, outg_ref,
                      h_scr, c_scr, whh_vmem, whh_sem, *, hp):
    """One recurrent step. Grid = (batch_blocks, T); time axis is sequential."""
    t = pl.program_id(1)

    @pl.when(t == 0)
    def _init():
        # Single-buffered weight load: W_hh^T lives in HBM (memory_space=ANY) and is
        # copied once per batch block into a persistent VMEM scratch buffer.
        cp = pltpu.make_async_copy(whh_hbm, whh_vmem, whh_sem)
        cp.start()
        cp.wait()
        h_scr[...] = h0_ref[...]
        c_scr[...] = c0_ref[...]

    h = h_scr[...]          # (tb, Hp)
    c = c_scr[...]          # (tb, Hp)

    # Recurrent projection only; the x-projection + bias were precomputed outside.
    gates = xg_ref[0] + jnp.dot(h, whh_vmem[...],
                                preferred_element_type=jnp.float32)   # (tb, 4*Hp)

    # hp is a multiple of 128, so these slices are lane-aligned (free views).
    ingate     = jax.nn.sigmoid(gates[:, 0 * hp:1 * hp])
    forgetgate = jax.nn.sigmoid(gates[:, 1 * hp:2 * hp])
    cellgate   = jnp.tanh(gates[:, 2 * hp:3 * hp])
    outgate    = jax.nn.sigmoid(gates[:, 3 * hp:4 * hp])

    c_new = forgetgate * c + ingate * cellgate
    h_new = outgate * jnp.tanh(c_new)

    c_scr[...] = c_new
    h_scr[...] = h_new

    # One lane-dense per-step store: [forgetgate | hidden | cellgate].
    fused_ref[0] = jnp.concatenate([forgetgate, h_new, cellgate], axis=-1)

    # The module only returns the last step's outgate.
    @pl.when(t == pl.num_programs(1) - 1)
    def _store_outgate():
        outg_ref[...] = outgate


@jax.jit
def _lstm_core(x, h0, c0, w_ih, w_hh, b_ih, b_hh):
    """Returns (forget_tm (T,B,H), hiddens (B,T,H), cellgates (B,T,H), outgate (B,H))."""
    B, T, D = x.shape
    H = h0.shape[-1]
    f32 = jnp.float32

    Hp = _round_up(max(H, 128), 128)    # lane-aligned hidden size
    Bp = _round_up(max(B, 8), 8)        # sublane-aligned batch

    # Megacore (v7x): shard independent batch blocks across the 2 TensorCores.
    nb = 2 if (Bp >= 16 and (Bp // 2) % 8 == 0) else 1
    tb = Bp // nb

    # ---- Hoisted input projection: one big (T*B, D) x (D, 4H) matmul + bias fold ----
    xg = jnp.einsum('btd,dg->tbg', x, w_ih.T,
                    preferred_element_type=f32) + (b_ih + b_hh)        # (T, B, 4H)
    if Hp != H or Bp != B:
        xg = xg.reshape(T, B, 4, H)
        xg = jnp.zeros((T, Bp, 4, Hp), f32).at[:, :B, :, :H].set(xg)
    xg = xg.reshape(T, Bp, 4 * Hp)

    # ---- W_hh^T laid out as (Hp, 4*Hp) with per-gate Hp-wide, lane-aligned blocks ----
    whh_t = w_hh.T.reshape(H, 4, H)
    if Hp != H:
        whh_t = jnp.zeros((Hp, 4, Hp), f32).at[:H, :, :H].set(whh_t)
    whh_t = whh_t.reshape(Hp, 4 * Hp)

    def _pad_state(a):
        if Bp == B and Hp == H:
            return a.astype(f32)
        return jnp.zeros((Bp, Hp), f32).at[:B, :H].set(a)

    h0_p = _pad_state(h0)
    c0_p = _pad_state(c0)

    kernel = functools.partial(_lstm_step_kernel, hp=Hp)

    out_shapes = (
        jax.ShapeDtypeStruct((T, Bp, 3 * Hp), f32),   # [forget | hidden | cellgate]
        jax.ShapeDtypeStruct((Bp, Hp), f32),          # last outgate
    )

    grid_spec = pltpu.PrefetchScalarGridSpec(
        num_scalar_prefetch=0,
        grid=(nb, T),
        in_specs=[
            pl.BlockSpec((1, tb, 4 * Hp), lambda b, t: (t, b, 0)),   # precomputed gates
            pl.BlockSpec((tb, Hp), lambda b, t: (b, 0)),             # h0
            pl.BlockSpec((tb, Hp), lambda b, t: (b, 0)),             # c0
            pl.BlockSpec(memory_space=pl.ANY),                       # W_hh^T (stays in HBM)
        ],
        out_specs=[
            pl.BlockSpec((1, tb, 3 * Hp), lambda b, t: (t, b, 0)),
            pl.BlockSpec((tb, Hp), lambda b, t: (b, 0)),
        ],
        scratch_shapes=[
            pltpu.VMEM((tb, Hp), f32),        # carried h
            pltpu.VMEM((tb, Hp), f32),        # carried c
            pltpu.VMEM((Hp, 4 * Hp), f32),    # single-buffered W_hh^T
            pltpu.SemaphoreType.DMA(()),      # completion sem for the W_hh load
        ],
    )

    fused, outg_p = pl.pallas_call(
        kernel,
        out_shape=out_shapes,
        grid_spec=grid_spec,
        compiler_params=pltpu.CompilerParams(
            dimension_semantics=("parallel", "arbitrary")),   # time is sequential
    )(xg, h0_p, c0_p, whh_t)

    forget_tm = fused[:, :B, 0:H]                                        # (T, B, H)
    hiddens   = jnp.transpose(fused[:, :B, Hp:Hp + H], (1, 0, 2))        # (B, T, H)
    cellgates = jnp.transpose(fused[:, :B, 2 * Hp:2 * Hp + H], (1, 0, 2))
    outgate   = outg_p[:B, :H]
    return forget_tm, hiddens, cellgates, outgate


def lstm_forward(x, h0, c0, w_ih, w_hh, b_ih, b_hh):
    forget_tm, hiddens, cellgates, outgate = _lstm_core(
        x, h0, c0, w_ih, w_hh, b_ih, b_hh)
    # PyTorch module returns a Python list of per-step forget gates (B, H).
    forgetgates = list(forget_tm)
    return forgetgates, hiddens, cellgates, outgate


def _reference(x, h0, c0, w_ih, w_hh, b_ih, b_hh):
    """Plain-JAX reference mirroring the PyTorch loop."""
    B, T, D = x.shape
    hx, cx = h0, c0
    forgets, hiddens, cellgates = [], [], []
    outgate = None
    for t in range(T):
        gates = x[:, t, :] @ w_ih.T + b_ih + hx @ w_hh.T + b_hh
        i, f, g, o = jnp.split(gates, 4, axis=1)
        i = jax.nn.sigmoid(i); f = jax.nn.sigmoid(f)
        g = jnp.tanh(g); o = jax.nn.sigmoid(o)
        cx = f * cx + i * g
        hx = o * jnp.tanh(cx)
        forgets.append(f); hiddens.append(hx); cellgates.append(g); outgate = o
    return forgets, jnp.stack(hiddens, 1), jnp.stack(cellgates, 1), outgate


if __name__ == "__main__":
    B, T, D, H = 4, 8, 16, 32
    key = jax.random.PRNGKey(0)
    kx, kh, kc, k1, k2, k3, k4 = jax.random.split(key, 7)

    stdv = 1.0 / math.sqrt(H)
    x = jax.random.normal(kx, (B, T, D), dtype=jnp.float32)
    h0 = jax.random.normal(kh, (B, H), dtype=jnp.float32)
    c0 = jax.random.normal(kc, (B, H), dtype=jnp.float32)
    w_ih = jax.random.uniform(k1, (4 * H, D), minval=-stdv, maxval=stdv, dtype=jnp.float32)
    w_hh = jax.random.uniform(k2, (4 * H, H), minval=-stdv, maxval=stdv, dtype=jnp.float32)
    b_ih = jax.random.uniform(k3, (4 * H,), minval=-stdv, maxval=stdv, dtype=jnp.float32)
    b_hh = jax.random.uniform(k4, (4 * H,), minval=-stdv, maxval=stdv, dtype=jnp.float32)

    forgetgates, hiddens, cellgates, outgate = lstm_forward(
        x, h0, c0, w_ih, w_hh, b_ih, b_hh)
    jax.block_until_ready(hiddens)
    jax.block_until_ready(outgate)

    # Correctness check against the plain-JAX reference.
    rf, rh, rc, ro = _reference(x, h0, c0, w_ih, w_hh, b_ih, b_hh)
    assert jnp.allclose(hiddens, rh, atol=1e-4, rtol=1e-4)
    assert jnp.allclose(cellgates, rc, atol=1e-4, rtol=1e-4)
    assert jnp.allclose(outgate, ro, atol=1e-4, rtol=1e-4)
    for a, b in zip(forgetgates, rf):
        assert jnp.allclose(a, b, atol=1e-4, rtol=1e-4)

    print("KERNEL_OK")
</pallas_src>

<mosaic_0001>
module attributes {stable_mosaic.version = 11 : i64} {
  func.func @_lstm_step_kernel(%arg0: i32, %arg1: i32, %arg2: memref<1x8x512xf32, #tpu.memory_space<vmem>>, %arg3: memref<8x128xf32, #tpu.memory_space<vmem>>, %arg4: memref<8x128xf32, #tpu.memory_space<vmem>>, %arg5: memref<128x512xf32, #tpu.memory_space<any>>, %arg6: memref<1x8x384xf32, #tpu.memory_space<vmem>>, %arg7: memref<8x128xf32, #tpu.memory_space<vmem>>, %arg8: memref<8x128xf32, #tpu.memory_space<vmem>>, %arg9: memref<8x128xf32, #tpu.memory_space<vmem>>, %arg10: memref<128x512xf32, #tpu.memory_space<vmem>>, %arg11: memref<!tpu.dma_semaphore, #tpu.memory_space<semaphore_mem>>) attributes {dimension_semantics = [#tpu.dimension_semantics<parallel>, #tpu.dimension_semantics<arbitrary>], iteration_bounds = array<i64: 1, 8>, scalar_prefetch = 0 : i64, scratch_operands = 4 : i64, tpu.core_type = #tpu.core_type<tc>, window_params = [{transform_indices = @transform_0, window_bounds = array<i64: 1, 8, 512>}, {transform_indices = @transform_1, window_bounds = array<i64: 8, 128>}, {transform_indices = @transform_2, window_bounds = array<i64: 8, 128>}, {}, {transform_indices = @transform_4, window_bounds = array<i64: 1, 8, 384>}, {transform_indices = @transform_5, window_bounds = array<i64: 8, 128>}]} {
    %c0_i32 = arith.constant 0 : i32
    %0 = arith.cmpi eq, %arg1, %c0_i32 : i32
    %1 = arith.extui %0 : i1 to i32
    %c0_i32_0 = arith.constant 0 : i32
    %2 = arith.cmpi ne, %1, %c0_i32_0 : i32
    scf.if %2 {
      tpu.enqueue_dma source(%arg5 : memref<128x512xf32, #tpu.memory_space<any>>) target(%arg10 : memref<128x512xf32, #tpu.memory_space<vmem>>) target_semaphore(%arg11 : memref<!tpu.dma_semaphore, #tpu.memory_space<semaphore_mem>>)
      tpu.wait_dma2 semaphore(%arg11 : memref<!tpu.dma_semaphore, #tpu.memory_space<semaphore_mem>>) src(%arg5 : memref<128x512xf32, #tpu.memory_space<any>>) dst(%arg10 : memref<128x512xf32, #tpu.memory_space<vmem>>)
      %c0_20 = arith.constant 0 : index
      %c0_21 = arith.constant 0 : index
      %44 = vector.load %arg3[%c0_20, %c0_21] : memref<8x128xf32, #tpu.memory_space<vmem>>, vector<8x128xf32>
      %c0_22 = arith.constant 0 : index
      %c0_23 = arith.constant 0 : index
      %45 = vector.load %arg8[%c0_22, %c0_23] : memref<8x128xf32, #tpu.memory_space<vmem>>, vector<8x128xf32>
      tpu.vector_store %arg8[%c0_22, %c0_23], %44 {strides = array<i32>} : memref<8x128xf32, #tpu.memory_space<vmem>>, vector<8x128xf32>,
      %c0_24 = arith.constant 0 : index
      %c0_25 = arith.constant 0 : index
      %46 = vector.load %arg4[%c0_24, %c0_25] : memref<8x128xf32, #tpu.memory_space<vmem>>, vector<8x128xf32>
      %c0_26 = arith.constant 0 : index
      %c0_27 = arith.constant 0 : index
      %47 = vector.load %arg9[%c0_26, %c0_27] : memref<8x128xf32, #tpu.memory_space<vmem>>, vector<8x128xf32>
      tpu.vector_store %arg9[%c0_26, %c0_27], %46 {strides = array<i32>} : memref<8x128xf32, #tpu.memory_space<vmem>>, vector<8x128xf32>,
    } else {
    }
    %c0 = arith.constant 0 : index
    %c0_1 = arith.constant 0 : index
    %3 = vector.load %arg8[%c0, %c0_1] : memref<8x128xf32, #tpu.memory_space<vmem>>, vector<8x128xf32>
    %c0_2 = arith.constant 0 : index
    %c0_3 = arith.constant 0 : index
    %4 = vector.load %arg9[%c0_2, %c0_3] : memref<8x128xf32, #tpu.memory_space<vmem>>, vector<8x128xf32>
    %c0_4 = arith.constant 0 : index
    %c0_5 = arith.constant 0 : index
    %c0_6 = arith.constant 0 : index
    %5 = vector.load %arg2[%c0_4, %c0_5, %c0_6] : memref<1x8x512xf32, #tpu.memory_space<vmem>>, vector<1x8x512xf32>
    %6 = vector.shape_cast %5 : vector<1x8x512xf32> to vector<8x512xf32>
    %c0_7 = arith.constant 0 : index
    %c0_8 = arith.constant 0 : index
    %7 = vector.load %arg10[%c0_7, %c0_8] : memref<128x512xf32, #tpu.memory_space<vmem>>, vector<128x512xf32>
    %cst = arith.constant dense<0.000000e+00> : vector<8x512xf32>
    %8 = tpu.matmul %3, %7, %cst {dimension_numbers = #tpu.dot_dimension_numbers<[1], [0], [0], [1], [0, 0, 1, 1], [], []>} : vector<8x128xf32>, vector<128x512xf32>, vector<8x512xf32> -> vector<8x512xf32>
    %9 = arith.addf %6, %8 : vector<8x512xf32>
    %10 = vector.extract_strided_slice %9 {offsets = [0, 0], sizes = [8, 128], strides = [1, 1]} : vector<8x512xf32> to vector<8x128xf32>
    %11 = arith.negf %10 : vector<8x128xf32>
    %12 = math.exp %11 : vector<8x128xf32>
    %cst_9 = arith.constant 1.000000e+00 : f32
    %13 = vector.broadcast %cst_9 : f32 to vector<8x128xf32>
    %14 = arith.addf %13, %12 : vector<8x128xf32>
    %15 = arith.divf %13, %14 : vector<8x128xf32>
    %16 = vector.extract_strided_slice %9 {offsets = [0, 128], sizes = [8, 128], strides = [1, 1]} : vector<8x512xf32> to vector<8x128xf32>
    %17 = arith.negf %16 : vector<8x128xf32>
    %18 = math.exp %17 : vector<8x128xf32>
    %cst_10 = arith.constant 1.000000e+00 : f32
    %19 = vector.broadcast %cst_10 : f32 to vector<8x128xf32>
    %20 = arith.addf %19, %18 : vector<8x128xf32>
    %21 = arith.divf %19, %20 : vector<8x128xf32>
    %22 = vector.extract_strided_slice %9 {offsets = [0, 256], sizes = [8, 128], strides = [1, 1]} : vector<8x512xf32> to vector<8x128xf32>
    %23 = math.tanh %22 : vector<8x128xf32>
    %24 = vector.extract_strided_slice %9 {offsets = [0, 384], sizes = [8, 128], strides = [1, 1]} : vector<8x512xf32> to vector<8x128xf32>
    %25 = arith.negf %24 : vector<8x128xf32>
    %26 = math.exp %25 : vector<8x128xf32>
    %cst_11 = arith.constant 1.000000e+00 : f32
    %27 = vector.broadcast %cst_11 : f32 to vector<8x128xf32>
    %28 = arith.addf %27, %26 : vector<8x128xf32>
    %29 = arith.divf %27, %28 : vector<8x128xf32>
    %30 = arith.mulf %21, %4 : vector<8x128xf32>
    %31 = arith.mulf %15, %23 : vector<8x128xf32>
    %32 = arith.addf %30, %31 : vector<8x128xf32>
    %33 = math.tanh %32 : vector<8x128xf32>
    %34 = arith.mulf %29, %33 : vector<8x128xf32>
    %c0_12 = arith.constant 0 : index
    %c0_13 = arith.constant 0 : index
    %35 = vector.load %arg9[%c0_12, %c0_13] : memref<8x128xf32, #tpu.memory_space<vmem>>, vector<8x128xf32>
    tpu.vector_store %arg9[%c0_12, %c0_13], %32 {strides = array<i32>} : memref<8x128xf32, #tpu.memory_space<vmem>>, vector<8x128xf32>,
    %c0_14 = arith.constant 0 : index
    %c0_15 = arith.constant 0 : index
    %36 = vector.load %arg8[%c0_14, %c0_15] : memref<8x128xf32, #tpu.memory_space<vmem>>, vector<8x128xf32>
    tpu.vector_store %arg8[%c0_14, %c0_15], %34 {strides = array<i32>} : memref<8x128xf32, #tpu.memory_space<vmem>>, vector<8x128xf32>,
    %37 = tpu.concatenate %21, %34, %23 in 1 : vector<8x128xf32>, vector<8x128xf32>, vector<8x128xf32> -> vector<8x384xf32>
    %c0_16 = arith.constant 0 : index
    %c0_17 = arith.constant 0 : index
    %c0_18 = arith.constant 0 : index
    %38 = vector.load %arg6[%c0_16, %c0_17, %c0_18] : memref<1x8x384xf32, #tpu.memory_space<vmem>>, vector<1x8x384xf32>
    %39 = vector.shape_cast %38 : vector<1x8x384xf32> to vector<8x384xf32>
    %40 = vector.shape_cast %37 : vector<8x384xf32> to vector<1x8x384xf32>
    tpu.vector_store %arg6[%c0_16, %c0_17, %c0_18], %40 {strides = array<i32>} : memref<1x8x384xf32, #tpu.memory_space<vmem>>, vector<1x8x384xf32>,
    %c7_i32 = arith.constant 7 : i32
    %41 = arith.cmpi eq, %arg1, %c7_i32 : i32
    %42 = arith.extui %41 : i1 to i32
    %c0_i32_19 = arith.constant 0 : i32
    %43 = arith.cmpi ne, %42, %c0_i32_19 : i32
    scf.if %43 {
      %c0_20 = arith.constant 0 : index
      %c0_21 = arith.constant 0 : index
      %44 = vector.load %arg7[%c0_20, %c0_21] : memref<8x128xf32, #tpu.memory_space<vmem>>, vector<8x128xf32>
      tpu.vector_store %arg7[%c0_20, %c0_21], %29 {strides = array<i32>} : memref<8x128xf32, #tpu.memory_space<vmem>>, vector<8x128xf32>,
    } else {
    }
    return
  }
  func.func @transform_0(%arg0: i32, %arg1: i32) -> (i32, i32, i32) {
    %c0_i32 = arith.constant 0 : i32
    %c0_i32_0 = arith.constant 0 : i32
    return %arg1, %arg0, %c0_i32 : i32, i32, i32
  }
  func.func @transform_1(%arg0: i32, %arg1: i32) -> (i32, i32) {
    %c0_i32 = arith.constant 0 : i32
    %c0_i32_0 = arith.constant 0 : i32
    return %arg0, %c0_i32 : i32, i32
  }
  func.func @transform_2(%arg0: i32, %arg1: i32) -> (i32, i32) {
    %c0_i32 = arith.constant 0 : i32
    %c0_i32_0 = arith.constant 0 : i32
    return %arg0, %c0_i32 : i32, i32
  }
  func.func @transform_4(%arg0: i32, %arg1: i32) -> (i32, i32, i32) {
    %c0_i32 = arith.constant 0 : i32
    %c0_i32_0 = arith.constant 0 : i32
    return %arg1, %arg0, %c0_i32 : i32, i32, i32
  }
  func.func @transform_5(%arg0: i32, %arg1: i32) -> (i32, i32) {
    %c0_i32 = arith.constant 0 : i32
    %c0_i32_0 = arith.constant 0 : i32
    return %arg0, %c0_i32 : i32, i32
  }
}

</mosaic_0001>

<bundles_post_ra>
// kernel: _lstm_core.1
= control target key start
LH: loop header
LB: loop body
LE: loop exit
PB: predicated region body
PF: predicated region fallthrough
CT: control target
= control target key end

     0   :  { %s995_s18 = smov 0   ;;  %s997_s19 = smov 0   ;;  %s1246_s0 = inlined_call_operand.vmem [shape: f32[8,8,512], index: 0, kind: input, shape index: {}]   ;;  %s1247_s1 = inlined_call_operand.vmem [shape: f32[8,128], index: 1, kind: input, shape index: {}]   ;;  %s1248_s2 = inlined_call_operand.vmem [shape: f32[8,128], index: 2, kind: input, shape index: {}]   ;;  %s1249_s3 = inlined_call_operand.vmem [shape: f32[128,512], index: 3, kind: input, shape index: {}]   ;;  %s1250_s4 = inlined_call_operand.vmem [shape: f32[8,8,384], index: 4, kind: output, shape index: {0}]   ;;  %s1251_s5 = inlined_call_operand.vmem [shape: f32[8,128], index: 5, kind: output, shape index: {1}]  }
   0x1   :  { %s999_s20 = smov 0  }
   0x2 LB: > { %s25_s21 = sadd.s32 1, %s958_s19  ;;  %p882_p0 = scmp.ge.s32.totalorder %s962_s20, 1  ;;  %s962_s20 = sphi %s999_s20, %s16_s20   ;;  %s958_s19 = sphi %s997_s19, %s1253_s19   ;;  %s954_s18 = sphi %s995_s18, %s1252_s18  }
   0x3   : > { %p26_p1 = scmp.ge.s32.totalorder %s25_s21, 8  ;;  %p204_p2 = scmp.lt.s32.totalorder %s962_s20, 9 }
   0x5   : > { %s1255_s21 = smov (%p26_p1, %s25_s21), 0  ;;  %p205_p3 = pnand %p882_p0, %p204_p2 }
   0x6   : > { %p250_p4 = scmp.lt.s32.totalorder (!%p205_p3), %s954_s18, 7  ;;  %p886_p5 = scmp.ne.s32.totalorder (!%p205_p3), %s954_s18, 0 }
   0x7   : > { %208 = sbr.rel (%p205_p3) target bundleno = 340 (0x154), region = 32 }
   0xc   : > { %s251_s22 = scalar_select %p250_p4, %s954_s18, 7 }
   0xd   : > { %283 = sbr.rel (%p886_p5) target bundleno = 56 (0x38), region = 36 }
   0xe   : > { %s895_s23 = sshll.u32 %s251_s22, 5  ;;  %s896_s24 = smul.u32 24, %s251_s22 }
   0xf   : > { %s1020_s27 = scalar_lea.vmem %s1246_s0, %s895_s23 }
  0x10   : > { %s1025_s30 = scalar_lea.vmem %s1250_s4, %s896_s24 }
  0x12   : > { %v317_v0 = vld [vmem:[%s1249_s3] sm:$0xff]  ;;  %v319_v1 = vld [vmem:[%s1249_s3 + $0x8] sm:$0xff]  ;;  %v321_v2 = vld [vmem:[%s1249_s3 + $0x10] sm:$0xff] }
  0x13   : > { %318 = vst [vmem:[#allocation4 + $0xb0] sm:$0xff] %v317_v0  ;;  %320 = vst [vmem:[#allocation4 + $0x1b0] sm:$0xff] %v319_v1  ;;  %v323_v3 = vld [vmem:[%s1249_s3 + $0x18] sm:$0xff]  ;;  %v325_v4 = vld [vmem:[%s1249_s3 + $0x20] sm:$0xff] }
  0x14   : > { %322 = vst [vmem:[#allocation4 + $0xd8] sm:$0xff] %v321_v2  ;;  %v327_v5 = vld [vmem:[%s1249_s3 + $0x28] sm:$0xff]  ;;  %324 = vst [vmem:[#allocation4 + $0x18] sm:$0xff] %v323_v3  ;;  %v329_v6 = vld [vmem:[%s1249_s3 + $0x30] sm:$0xff] }
  0x15   : > { %326 = vst [vmem:[#allocation4 + $0x50] sm:$0xff] %v325_v4  ;;  %328 = vst [vmem:[#allocation4 + $0x168] sm:$0xff] %v327_v5  ;;  %v331_v7 = vld [vmem:[%s1249_s3 + $0x38] sm:$0xff]  ;;  %v333_v8 = vld [vmem:[%s1249_s3 + $0x40] sm:$0xff] }
  0x16   : > { %330 = vst [vmem:[#allocation4 + $0x130] sm:$0xff] %v329_v6  ;;  %332 = vst [vmem:[#allocation4 + $0x48] sm:$0xff] %v331_v7  ;;  %v335_v9 = vld [vmem:[%s1249_s3 + $0x48] sm:$0xff]  ;;  %v337_v10 = vld [vmem:[%s1249_s3 + $0x50] sm:$0xff] }
  0x17   : > { %334 = vst [vmem:[#allocation4 + $0x180] sm:$0xff] %v333_v8  ;;  %v339_v11 = vld [vmem:[%s1249_s3 + $0x58] sm:$0xff]  ;;  %336 = vst [vmem:[#allocation4 + $0x110] sm:$0xff] %v335_v9  ;;  %v341_v12 = vld [vmem:[%s1249_s3 + $0x60] sm:$0xff] }
  0x18   : > { %338 = vst [vmem:[#allocation4 + $0x118] sm:$0xff] %v337_v10  ;;  %340 = vst [vmem:[#allocation4 + $0x98] sm:$0xff] %v339_v11  ;;  %v343_v13 = vld [vmem:[%s1249_s3 + $0x68] sm:$0xff]  ;;  %v345_v14 = vld [vmem:[%s1249_s3 + $0x70] sm:$0xff] }
  0x19   : > { %342 = vst [vmem:[#allocation4 + $0x120] sm:$0xff] %v341_v12  ;;  %344 = vst [vmem:[#allocation4 + $0x150] sm:$0xff] %v343_v13  ;;  %v347_v15 = vld [vmem:[%s1249_s3 + $0x78] sm:$0xff]  ;;  %v349_v16 = vld [vmem:[%s1249_s3 + $0x80] sm:$0xff] }
  0x1a   : > { %346 = vst [vmem:[#allocation4 + $0x108] sm:$0xff] %v345_v14  ;;  %v351_v17 = vld [vmem:[%s1249_s3 + $0x88] sm:$0xff]  ;;  %348 = vst [vmem:[#allocation4 + $0x60] sm:$0xff] %v347_v15  ;;  %v353_v18 = vld [vmem:[%s1249_s3 + $0x90] sm:$0xff] }
  0x1b   : > { %350 = vst [vmem:[#allocation4 + $0xe0] sm:$0xff] %v349_v16  ;;  %352 = vst [vmem:[#allocation4 + $0x188] sm:$0xff] %v351_v17  ;;  %v355_v19 = vld [vmem:[%s1249_s3 + $0x98] sm:$0xff]  ;;  %v357_v20 = vld [vmem:[%s1249_s3 + $0xa0] sm:$0xff] }
  0x1c   : > { %354 = vst [vmem:[#allocation4 + $0x138] sm:$0xff] %v353_v18  ;;  %356 = vst [vmem:[#allocation4 + $0x140] sm:$0xff] %v355_v19  ;;  %v359_v21 = vld [vmem:[%s1249_s3 + $0xa8] sm:$0xff]  ;;  %v361_v22 = vld [vmem:[%s1249_s3 + $0xb0] sm:$0xff] }
  0x1d   : > { %358 = vst [vmem:[#allocation4 + $0x80] sm:$0xff] %v357_v20  ;;  %v363_v23 = vld [vmem:[%s1249_s3 + $0xb8] sm:$0xff]  ;;  %360 = vst [vmem:[#allocation4 + $0x1a8] sm:$0xff] %v359_v21  ;;  %v365_v24 = vld [vmem:[%s1249_s3 + $0xc0] sm:$0xff] }
  0x1e   : > { %362 = vst [vmem:[#allocation4 + $0x1b8] sm:$0xff] %v361_v22  ;;  %364 = vst [vmem:[#allocation4 + $0x28] sm:$0xff] %v363_v23  ;;  %v367_v25 = vld [vmem:[%s1249_s3 + $0xc8] sm:$0xff]  ;;  %v369_v26 = vld [vmem:[%s1249_s3 + $0xd0] sm:$0xff] }
  0x1f   : > { %366 = vst [vmem:[#allocation4 + $0x1e8] sm:$0xff] %v365_v24  ;;  %368 = vst [vmem:[#allocation4 + $0xf8] sm:$0xff] %v367_v25  ;;  %v371_v27 = vld [vmem:[%s1249_s3 + $0xd8] sm:$0xff]  ;;  %v373_v28 = vld [vmem:[%s1249_s3 + $0xe0] sm:$0xff] }
  0x20   : > { %370 = vst [vmem:[#allocation4 + $0x160] sm:$0xff] %v369_v26  ;;  %v375_v29 = vld [vmem:[%s1249_s3 + $0xe8] sm:$0xff]  ;;  %372 = vst [vmem:[#allocation4 + $0x30] sm:$0xff] %v371_v27  ;;  %v377_v30 = vld [vmem:[%s1249_s3 + $0xf0] sm:$0xff] }
  0x21   : > { %374 = vst [vmem:[#allocation4 + $0x1e0] sm:$0xff] %v373_v28  ;;  %376 = vst [vmem:[#allocation4] sm:$0xff] %v375_v29  ;;  %v379_v31 = vld [vmem:[%s1249_s3 + $0xf8] sm:$0xff]  ;;  %v381_v32 = vld [vmem:[%s1249_s3 + $0x100] sm:$0xff] }
  0x22   : > { %378 = vst [vmem:[#allocation4 + $0xf0] sm:$0xff] %v377_v30  ;;  %380 = vst [vmem:[#allocation4 + $0x8] sm:$0xff] %v379_v31  ;;  %v383_v33 = vld [vmem:[%s1249_s3 + $0x108] sm:$0xff]  ;;  %v385_v34 = vld [vmem:[%s1249_s3 + $0x110] sm:$0xff] }
  0x23   : > { %382 = vst [vmem:[#allocation4 + $0x148] sm:$0xff] %v381_v32  ;;  %v387_v35 = vld [vmem:[%s1249_s3 + $0x118] sm:$0xff]  ;;  %384 = vst [vmem:[#allocation4 + $0x1d0] sm:$0xff] %v383_v33  ;;  %v389_v36 = vld [vmem:[%s1249_s3 + $0x120] sm:$0xff] }
  0x24   : > { %386 = vst [vmem:[#allocation4 + $0x100] sm:$0xff] %v385_v34  ;;  %388 = vst [vmem:[#allocation4 + $0xc8] sm:$0xff] %v387_v35  ;;  %v391_v37 = vld [vmem:[%s1249_s3 + $0x128] sm:$0xff]  ;;  %v393_v38 = vld [vmem:[%s1249_s3 + $0x130] sm:$0xff] }
  0x25   : > { %390 = vst [vmem:[#allocation4 + $0x40] sm:$0xff] %v389_v36  ;;  %392 = vst [vmem:[#allocation4 + $0x1f8] sm:$0xff] %v391_v37  ;;  %v395_v39 = vld [vmem:[%s1249_s3 + $0x138] sm:$0xff]  ;;  %v397_v40 = vld [vmem:[%s1249_s3 + $0x140] sm:$0xff] }
  0x26   : > { %394 = vst [vmem:[#allocation4 + $0x20] sm:$0xff] %v393_v38  ;;  %v399_v41 = vld [vmem:[%s1249_s3 + $0x148] sm:$0xff]  ;;  %396 = vst [vmem:[#allocation4 + $0x128] sm:$0xff] %v395_v39  ;;  %v401_v42 = vld [vmem:[%s1249_s3 + $0x150] sm:$0xff] }
  0x27   : > { %398 = vst [vmem:[#allocation4 + $0x1a0] sm:$0xff] %v397_v40  ;;  %400 = vst [vmem:[#allocation4 + $0x1f0] sm:$0xff] %v399_v41  ;;  %v403_v43 = vld [vmem:[%s1249_s3 + $0x158] sm:$0xff]  ;;  %v405_v44 = vld [vmem:[%s1249_s3 + $0x160] sm:$0xff] }
  0x28   : > { %402 = vst [vmem:[#allocation4 + $0xe8] sm:$0xff] %v401_v42  ;;  %404 = vst [vmem:[#allocation4 + $0x78] sm:$0xff] %v403_v43  ;;  %v407_v45 = vld [vmem:[%s1249_s3 + $0x168] sm:$0xff]  ;;  %v409_v46 = vld [vmem:[%s1249_s3 + $0x170] sm:$0xff] }
  0x29   : > { %406 = vst [vmem:[#allocation4 + $0x70] sm:$0xff] %v405_v44  ;;  %v411_v47 = vld [vmem:[%s1249_s3 + $0x178] sm:$0xff]  ;;  %408 = vst [vmem:[#allocation4 + $0x90] sm:$0xff] %v407_v45  ;;  %v413_v48 = vld [vmem:[%s1249_s3 + $0x180] sm:$0xff] }
  0x2a   : > { %410 = vst [vmem:[#allocation4 + $0x1d8] sm:$0xff] %v409_v46  ;;  %412 = vst [vmem:[#allocation4 + $0xd0] sm:$0xff] %v411_v47  ;;  %v415_v49 = vld [vmem:[%s1249_s3 + $0x188] sm:$0xff]  ;;  %v417_v50 = vld [vmem:[%s1249_s3 + $0x190] sm:$0xff] }
  0x2b   : > { %414 = vst [vmem:[#allocation4 + $0xb8] sm:$0xff] %v413_v48  ;;  %416 = vst [vmem:[#allocation4 + $0x88] sm:$0xff] %v415_v49  ;;  %v419_v51 = vld [vmem:[%s1249_s3 + $0x198] sm:$0xff]  ;;  %v421_v52 = vld [vmem:[%s1249_s3 + $0x1a0] sm:$0xff] }
  0x2c   : > { %418 = vst [vmem:[#allocation4 + $0xa8] sm:$0xff] %v417_v50  ;;  %v423_v53 = vld [vmem:[%s1249_s3 + $0x1a8] sm:$0xff]  ;;  %420 = vst [vmem:[#allocation4 + $0x1c8] sm:$0xff] %v419_v51  ;;  %v425_v54 = vld [vmem:[%s1249_s3 + $0x1b0] sm:$0xff] }
  0x2d   : > { %422 = vst [vmem:[#allocation4 + $0x170] sm:$0xff] %v421_v52  ;;  %424 = vst [vmem:[#allocation4 + $0x178] sm:$0xff] %v423_v53  ;;  %v427_v55 = vld [vmem:[%s1249_s3 + $0x1b8] sm:$0xff]  ;;  %v429_v56 = vld [vmem:[%s1249_s3 + $0x1c0] sm:$0xff] }
  0x2e   : > { %426 = vst [vmem:[#allocation4 + $0x68] sm:$0xff] %v425_v54  ;;  %428 = vst [vmem:[#allocation4 + $0x190] sm:$0xff] %v427_v55  ;;  %v431_v57 = vld [vmem:[%s1249_s3 + $0x1c8] sm:$0xff]  ;;  %v433_v58 = vld [vmem:[%s1249_s3 + $0x1d0] sm:$0xff] }
  0x2f   : > { %430 = vst [vmem:[#allocation4 + $0x198] sm:$0xff] %v429_v56  ;;  %v435_v59 = vld [vmem:[%s1249_s3 + $0x1d8] sm:$0xff]  ;;  %432 = vst [vmem:[#allocation4 + $0x38] sm:$0xff] %v431_v57  ;;  %v437_v60 = vld [vmem:[%s1249_s3 + $0x1e0] sm:$0xff] }
  0x30   : > { %434 = vst [vmem:[#allocation4 + $0xc0] sm:$0xff] %v433_v58  ;;  %436 = vst [vmem:[#allocation4 + $0x1c0] sm:$0xff] %v435_v59  ;;  %v439_v61 = vld [vmem:[%s1249_s3 + $0x1e8] sm:$0xff]  ;;  %v441_v62 = vld [vmem:[%s1249_s3 + $0x1f0] sm:$0xff] }
  0x31   : > { %438 = vst [vmem:[#allocation4 + $0x158] sm:$0xff] %v437_v60  ;;  %440 = vst [vmem:[#allocation4 + $0x10] sm:$0xff] %v439_v61  ;;  %v443_v63 = vld [vmem:[%s1249_s3 + $0x1f8] sm:$0xff] }
  0x32   : > { %442 = vst [vmem:[#allocation4 + $0x58] sm:$0xff] %v441_v62  ;;  %444 = vst [vmem:[#allocation4 + $0xa0] sm:$0xff] %v443_v63 }
  0x33   : > { %452 = vsyncadd [#allocation5], 8192 }
  0x34   : > { %950 = dma.done.wait [#allocation5], 8192 }
  0x35   : > { %951 = vsyncadd [#allocation5], 4294959104  ;;  %v457_v0 = vld [vmem:[%s1247_s1] sm:$0xff] }
  0x36   : > { %v459_v1 = vld [vmem:[%s1248_s2] sm:$0xff]  ;;  %458 = vst [vmem:[#allocation2] sm:$0xff] %v457_v0 }
  0x37   : > { %460 = vst [vmem:[#allocation3] sm:$0xff] %v459_v1 }
  0x38 PF: > { %v528_v2 = vld [vmem:[#allocation4 + $0x10] sm:$0xff]  ;;  %v527_v3 = vld [vmem:[#allocation4 + $0x158] sm:$0xff]  ;;  %v964_v6 = vmov 0.0   ;;  %v516_v9 = vld [vmem:[#allocation4 + $0x88] sm:$0xff]  ;;  %p890_p6 = scmp.ne.s32.totalorder %s954_s18, 7 }
  0x39   : > { %v524_v4 = vld [vmem:[#allocation4 + $0x38] sm:$0xff]  ;;  %531 = vmatprep.subr.mxu0 %v528_v2  ;;  %595 = vmatprep.mubr.f32.mxu0 %v964_v6  ;;  %v519_v8 = vld [vmem:[#allocation4 + $0x170] sm:$0xff]  ;;  %v530_v11 = vld [vmem:[#allocation4 + $0xa0] sm:$0xff] }
  0x3a   : > { %v523_v5 = vld [vmem:[#allocation4 + $0x198] sm:$0xff]  ;;  %532 = vmatpush1.msra.mxu0 %v527_v3  ;;  %666 = vmatprep.mubr.f32.mxu1 %v964_v6  ;;  %v512_v12 = vld [vmem:[#allocation4 + $0x90] sm:$0xff]  ;;  %v526_v15 = vld [vmem:[#allocation4 + $0x1c0] sm:$0xff] }
  0x3b   : > { %v520_v7 = vld [vmem:[#allocation4 + $0x178] sm:$0xff]  ;;  %533 = vmatprep.subr.mxu0 %v524_v4  ;;  %602 = vmatprep.subr.mxu1 %v530_v11  ;;  %v511_v14 = vld [vmem:[#allocation4 + $0x70] sm:$0xff]  ;;  %v525_v16 = vld [vmem:[#allocation4 + $0xc0] sm:$0xff] }
  0x3c   : > { %534 = vmatpush1.msra.mxu0 %v523_v5  ;;  %v515_v10 = vld [vmem:[#allocation4 + $0xb8] sm:$0xff]  ;;  %v508_v17 = vld [vmem:[#allocation4 + $0x1f0] sm:$0xff]  ;;  %v507_v19 = vld [vmem:[#allocation4 + $0x1a0] sm:$0xff] }
  0x3d   : > { %535 = vmatprep.subr.mxu0 %v520_v7  ;;  %v529_v13 = vld [vmem:[#allocation4 + $0x58] sm:$0xff]  ;;  %v522_v18 = vld [vmem:[#allocation4 + $0x190] sm:$0xff]  ;;  %v521_v20 = vld [vmem:[#allocation4 + $0x68] sm:$0xff] }
  0x3e   : > { %536 = vmatpush1.msra.mxu0 %v519_v8  ;;  %603 = vmatpush1.msra.mxu1 %v529_v13  ;;  %v518_v21 = vld [vmem:[#allocation4 + $0x1c8] sm:$0xff]  ;;  %v504_v22 = vld [vmem:[#allocation4 + $0x1f8] sm:$0xff]  ;;  %v503_v24 = vld [vmem:[#allocation4 + $0x40] sm:$0xff] }
  0x3f   : > { %537 = vmatprep.subr.mxu0 %v516_v9  ;;  %604 = vmatprep.subr.mxu1 %v526_v15  ;;  %v517_v23 = vld [vmem:[#allocation4 + $0xa8] sm:$0xff]  ;;  %v514_v25 = vld [vmem:[#allocation4 + $0xd0] sm:$0xff]  ;;  %v513_v27 = vld [vmem:[#allocation4 + $0x1d8] sm:$0xff] }
  0x40   : > { %538 = vmatpush1.msra.mxu0 %v515_v10  ;;  %605 = vmatpush1.msra.mxu1 %v525_v16  ;;  %v500_v26 = vld [vmem:[#allocation4 + $0x1d0] sm:$0xff]  ;;  %v499_v28 = vld [vmem:[#allocation4 + $0x148] sm:$0xff]  ;;  %v510_v29 = vld [vmem:[#allocation4 + $0x78] sm:$0xff] }
  0x41   : > { %539 = vmatprep.subr.mxu0 %v512_v12  ;;  %606 = vmatprep.subr.mxu1 %v522_v18  ;;  %v496_v30 = vld [vmem:[#allocation4] sm:$0xff]  ;;  %v509_v31 = vld [vmem:[#allocation4 + $0xe8] sm:$0xff]  ;;  %v492_v34 = vld [vmem:[#allocation4 + $0xf8] sm:$0xff] }
  0x42   : > { %540 = vmatpush1.msra.mxu0 %v511_v14  ;;  %607 = vmatpush1.msra.mxu1 %v521_v20  ;;  %v495_v32 = vld [vmem:[#allocation4 + $0x1e0] sm:$0xff]  ;;  %v506_v33 = vld [vmem:[#allocation4 + $0x128] sm:$0xff]  ;;  %v497_v43 = vld [vmem:[#allocation4 + $0xf0] sm:$0xff] }
  0x43   : > { %541 = vmatprep.subr.mxu0 %v508_v17  ;;  %608 = vmatprep.subr.mxu1 %v518_v21  ;;  %v505_v35 = vld [vmem:[#allocation4 + $0x20] sm:$0xff]  ;;  %v491_v36 = vld [vmem:[#allocation4 + $0x1e8] sm:$0xff]  ;;  %v494_v45 = vld [vmem:[#allocation4 + $0x30] sm:$0xff] }
  0x44   : > { %542 = vmatpush1.msra.mxu0 %v507_v19  ;;  %609 = vmatpush1.msra.mxu1 %v517_v23  ;;  %v502_v37 = vld [vmem:[#allocation4 + $0xc8] sm:$0xff]  ;;  %v501_v39 = vld [vmem:[#allocation4 + $0x100] sm:$0xff]  ;;  %v480_v46 = vld [vmem:[#allocation4 + $0x150] sm:$0xff] }
  0x45   : > { %543 = vmatprep.subr.mxu0 %v504_v22  ;;  %610 = vmatprep.subr.mxu1 %v514_v25  ;;  %v488_v38 = vld [vmem:[#allocation4 + $0x1a8] sm:$0xff]  ;;  %v487_v40 = vld [vmem:[#allocation4 + $0x80] sm:$0xff]  ;;  %v476_v50 = vld [vmem:[#allocation4 + $0x110] sm:$0xff] }
  0x46   : > { %544 = vmatpush1.msra.mxu0 %v503_v24  ;;  %611 = vmatpush1.msra.mxu1 %v513_v27  ;;  %v498_v41 = vld [vmem:[#allocation4 + $0x8] sm:$0xff]  ;;  %v483_v44 = vld [vmem:[#allocation4 + $0xe0] sm:$0xff]  ;;  %v489_v51 = vld [vmem:[#allocation4 + $0x1b8] sm:$0xff] }
  0x47   : > { %545 = vmatprep.subr.mxu0 %v500_v26  ;;  %612 = vmatprep.subr.mxu1 %v510_v29  ;;  %v484_v42 = vld [vmem:[#allocation4 + $0x188] sm:$0xff]  ;;  %v493_v47 = vld [vmem:[#allocation4 + $0x160] sm:$0xff]  ;;  %v485_v55 = vld [vmem:[#allocation4 + $0x138] sm:$0xff] }
  0x48   : > { %546 = vmatpush1.msra.mxu0 %v499_v28  ;;  %613 = vmatpush1.msra.mxu1 %v509_v31  ;;  %v479_v48 = vld [vmem:[#allocation4 + $0x120] sm:$0xff]  ;;  %v490_v49 = vld [vmem:[#allocation4 + $0x28] sm:$0xff]  ;;  %v471_v56 = vld [vmem:[#allocation4 + $0x50] sm:$0xff] }
  0x49   : > { %547 = vmatprep.subr.mxu0 %v496_v30  ;;  %614 = vmatprep.subr.mxu1 %v506_v33  ;;  %v475_v52 = vld [vmem:[#allocation4 + $0x180] sm:$0xff]  ;;  %v472_v54 = vld [vmem:[#allocation4 + $0x168] sm:$0xff]  ;;  %v468_v58 = vld [vmem:[#allocation4 + $0x1b0] sm:$0xff] }
  0x4a   : > { %548 = vmatpush1.msra.mxu0 %v495_v32  ;;  %615 = vmatpush1.msra.mxu1 %v505_v35  ;;  %v486_v53 = vld [vmem:[#allocation4 + $0x140] sm:$0xff]  ;;  %v481_v59 = vld [vmem:[#allocation4 + $0x108] sm:$0xff]  ;;  %v467_v60 = vld [vmem:[#allocation4 + $0xb0] sm:$0xff] }
  0x4b   : > { %549 = vmatprep.subr.mxu0 %v492_v34  ;;  %616 = vmatprep.subr.mxu1 %v502_v37  ;;  %v482_v57 = vld [vmem:[#allocation4 + $0x60] sm:$0xff]  ;;  %v478_v61 = vld [vmem:[#allocation4 + $0x98] sm:$0xff]  ;;  %v461_v62 = vld [vmem:[#allocation2] sm:$0xff] }
  0x4c   : > { %550 = vmatpush1.msra.mxu0 %v491_v36  ;;  %617 = vmatpush1.msra.mxu1 %v501_v39  ;;  %v477_v63 = vld [vmem:[#allocation4 + $0x118] sm:$0xff]  ;;  %v474_v0 = vld [vmem:[#allocation4 + $0x48] sm:$0xff]  ;;  %v473_v1 = vld [vmem:[#allocation4 + $0x130] sm:$0xff] }
  0x4d   : > { %551 = vmatprep.subr.mxu0 %v488_v38  ;;  %618 = vmatprep.subr.mxu1 %v498_v41  ;;  %v470_v2 = vld [vmem:[#allocation4 + $0x18] sm:$0xff]  ;;  %v463_v4 = vld [vmem:[%s1020_s27] sm:$0xff]  ;;  %v465_v11 = vld [vmem:[%s1020_s27 + $0x10] sm:$0xff] }
  0x4e   : > { %552 = vmatpush1.msra.mxu0 %v487_v40  ;;  %619 = vmatpush1.msra.mxu1 %v497_v43  ;;  %v469_v3 = vld [vmem:[#allocation4 + $0xd8] sm:$0xff]  ;;  %v466_v15 = vld [vmem:[%s1020_s27 + $0x18] sm:$0xff] }
  0x4f   : > { %553 = vmatprep.subr.mxu0 %v484_v42  ;;  %620 = vmatprep.subr.mxu1 %v494_v45  ;;  %v464_v6 = vld [vmem:[%s1020_s27 + $0x8] sm:$0xff] }
  0x50   : > { %554 = vmatpush1.msra.mxu0 %v483_v44  ;;  %621 = vmatpush1.msra.mxu1 %v493_v47  ;;  %v462_v26 = vld [vmem:[#allocation3] sm:$0xff] }
  0x51   : > { %555 = vmatprep.subr.mxu0 %v480_v46  ;;  %622 = vmatprep.subr.mxu1 %v490_v49 }
  0x52   : > { %556 = vmatpush1.msra.mxu0 %v479_v48  ;;  %623 = vmatpush1.msra.mxu1 %v489_v51 }
  0x53   : > { %557 = vmatprep.subr.mxu0 %v476_v50  ;;  %624 = vmatprep.subr.mxu1 %v486_v53 }
  0x54   : > { %558 = vmatpush1.msra.mxu0 %v475_v52  ;;  %625 = vmatpush1.msra.mxu1 %v485_v55 }
  0x55   : > { %559 = vmatprep.subr.mxu0 %v472_v54  ;;  %626 = vmatprep.subr.mxu1 %v482_v57 }
  0x56   : > { %560 = vmatpush1.msra.mxu0 %v471_v56  ;;  %627 = vmatpush1.msra.mxu1 %v481_v59 }
  0x57   : > { %561 = vmatprep.subr.mxu0 %v468_v58  ;;  %628 = vmatprep.subr.mxu1 %v478_v61 }
  0x58   : > { %562 = vmatpush1.msra.mxu0 %v467_v60  ;;  %629 = vmatpush1.msra.mxu1 %v477_v63 }
  0x59   : > { %596 = vmatmul.mubr.f32.vlgmr.msra.gmra.mxu0 %v461_v62  ;;  %630 = vmatprep.subr.mxu1 %v474_v0 }
  0x5a   : > { %631 = vmatpush1.msra.mxu1 %v473_v1 }
  0x5b   : > { %632 = vmatprep.subr.mxu1 %v470_v2 }
  0x5c   : > { %633 = vmatpush1.msra.mxu1 %v469_v3 }
  0x5d   : > { %667 = vmatmul.mubr.f32.vlgmr.msra.gmra.mxu1 %v461_v62 }
 0x119   : > { %v597_v5 = vpop.f32.mrf.mxu0 }
 0x11a   : > { %v673_v7 = vadd.f32 %v597_v5, %v463_v4 }
 0x11b   : > { %v599_v8 = vpop.f32.mrf.mxu0 }
 0x11c   : > { %v887_v9 = vmul.f32 -1.442695, %v673_v7  ;;  %v674_v10 = vadd.f32 %v599_v8, %v464_v6 }
 0x11d   : > { %v668_v13 = vpop.f32.mrf.mxu1 }
 0x11e   : > { %922 = vpow2.f32 %v887_v9  ;;  %v888_v12 = vmul.f32 -1.442695, %v674_v10  ;;  %v675_v14 = vadd.f32 %v668_v13, %v465_v11 }
 0x11f   : > { %v670_v16 = vpop.f32.mrf.mxu1 }
 0x120   : > { %924 = vpow2.f32 %v888_v12  ;;  %v676_v17 = vadd.f32 %v670_v16, %v466_v15 }
 0x121   : > { %926 = vtanh.f32 %v675_v14 }
 0x122   : > { %v889_v18 = vmul.f32 -1.442695, %v676_v17 }
 0x124   : > { %928 = vpow2.f32 %v889_v18 }
 0x12b   : > { %v923_v19 = vpop.eup %922 }
 0x12c   : > { %v680_v20 = vadd.f32 1.0, %v923_v19 }
 0x12d   : > { %v925_v21 = vpop.eup %924 }
 0x12e   : > { %v927_v22 = vpop.eup %926  ;;  %930 = vrcp.f32 %v680_v20  ;;  %v686_v23 = vadd.f32 1.0, %v925_v21 }
 0x12f   : > { %705 = vst [vmem:[%s1025_s30 + $0x10] sm:$0xff] %v927_v22 }
 0x130   : > { %932 = vrcp.f32 %v686_v23 }
 0x131   : > { %v929_v24 = vpop.eup %928 }
 0x132   : > { %v693_v28 = vadd.f32 1.0, %v929_v24 }
 0x134   : > { %934 = vrcp.f32 %v693_v28 }
 0x13b   : > { %v931_v25 = vpop.eup %930 }
 0x13c   : > { %v697_v30 = vmul.f32 %v931_v25, %v927_v22 }
 0x13d   : > { %v933_v27 = vpop.eup %932 }
 0x13e   : > { %703 = vst [vmem:[%s1025_s30] sm:$0xff] %v933_v27  ;;  %v696_v29 = vmul.f32 %v933_v27, %v462_v26 }
 0x140   : > { %v698_v31 = vadd.f32 %v697_v30, %v696_v29 }
 0x141   : > { %v935_v32 = vpop.eup %934 }
 0x142   : > { %936 = vtanh.f32 %v698_v31  ;;  %701 = vst [vmem:[#allocation3] sm:$0xff] %v698_v31 }
 0x14e   : > { %709 = sbr.rel (%p890_p6) target bundleno = 340 (0x154), region = 74 }
 0x14f   : > { %v937_v33 = vpop.eup %936 }
 0x150   : > { %v700_v34 = vmul.f32 %v937_v33, %v935_v32 }
 0x152   : > { %702 = vst [vmem:[#allocation2] sm:$0xff] %v700_v34  ;;  %704 = vst [vmem:[%s1025_s30 + $0x8] sm:$0xff] %v700_v34 }
 0x153   : > { %710 = vst [vmem:[%s1251_s5] sm:$0xff] %v935_v32 }
 0x154 PF: > { %s16_s20 = sadd.s32 1, %s962_s20   ;;  %s1252_s18 = smov %s958_s19 }
 0x155   : > { %p13_p7 = scmp.ge.s32.totalorder %s16_s20, 10   ;;  %s1253_s19 = smov %s1255_s21 }
 0x157   :  { %15 = sbr.rel (!%p13_p7) target bundleno = 2 (0x2), region = 130 }
 0x15c   :  { %754 = vsyncmov [#allocation5] }
 0x15f   :  { %s755_s30 = vpop.sfrf %754 }
 0x160   :  { %p894_p8 = scmp.ne.s32.totalorder %s755_s30, 0 }
 0x162   :  { %759 = shalt.err (%p894_p8)  }

</bundles_post_ra>
